<compile_context>
chip_gen: v6e
topology: v6e:2x2x1
jax: 0.10.0
libtpu: 0.0.40
codegen_flags: <defaults>
</compile_context>

<pallas_src>
import jax
import jax.numpy as jnp
from jax.experimental import pallas as pl
from jax.experimental.pallas import tpu as pltpu

_LANE = 128


def _stereo_scaling_kernel(scale_ref, attn_ref, out_ref):
    # scale_ref: (1, Lc)  -- period-S repeated per-row scale (attn dtype)
    # attn_ref : (Tb, Lc) -- attention tile
    # out_ref  : (Tb, Lc)
    out_ref[...] = attn_ref[...] * scale_ref[...]


def _sublane_multiple(dtype) -> int:
    # Sub-32-bit dtypes pack rows along sublanes: f32 -> 8, bf16 -> 16, int8 -> 32.
    return max(8, 32 // jnp.dtype(dtype).itemsize)


def _round_up(x: int, m: int) -> int:
    return ((x + m - 1) // m) * m


def _choose_tiles(n_rows: int, n_cols: int, itemsize: int, sub_mult: int,
                  target_bytes: int):
    """Pick (row_tile, col_tile) for a (n_rows, n_cols) elementwise stream.

    Col tile is a multiple of 128 (or the full extent), row tile is a multiple
    of the dtype sublane pack (or the full extent), the block stays around
    `target_bytes`, and the grid has >= 2 steps whenever the layout rules
    allow a split (keeps both v7x TensorCores busy)."""
    target_elems = max(sub_mult * _LANE, target_bytes // itemsize)

    # Lane (last-dim) tile: big & 128-aligned. Capped so the row tile can stay
    # reasonably deep, which amortizes the tiny per-step scale-row DMA.
    if n_cols <= _LANE:
        lc = n_cols
    else:
        lc_cap = min(n_cols, max(_LANE, target_elems // sub_mult), 32768)
        lc = (lc_cap // _LANE) * _LANE
        if lc >= n_cols:
            lc = n_cols

    # Sublane (row) tile.
    max_tb = max(1, target_elems // lc)
    if n_rows <= max_tb:
        tb = n_rows
    else:
        tb = max(sub_mult, (max_tb // sub_mult) * sub_mult)

    # If everything landed in a single block, split once so the grid has >= 2
    # (parallel) steps when legal: megacore sharding + something to pipeline.
    if pl.cdiv(n_rows, tb) * pl.cdiv(n_cols, lc) == 1:
        if n_rows > sub_mult:
            half = _round_up((n_rows + 1) // 2, sub_mult)
            if half < n_rows:
                tb = half
        elif n_cols > _LANE:
            half = _round_up((n_cols + 1) // 2, _LANE)
            if half < n_cols:
                lc = half
    return tb, lc


def stereo_scaling(attn: jax.Array, x0: jax.Array, *, eps: float = 1e-05,
                   target_block_bytes: int = 6 << 20) -> jax.Array:
    """Pallas TPU forward of StereoScaling.

    attn: (B, H, S, S) attention map; x0: (1, 1, S, 1) learnable parameter.
    """
    B, H, S, S2 = attn.shape
    assert S == S2, "expected a square attention map"
    assert x0.shape == (1, 1, S, 1)

    n_rows, n_cols = B * H, S * S
    attn2d = attn.reshape(n_rows, n_cols)     # free bitcast for row-major attn

    # Per-row stereographic scale, computed exactly as the reference (f32),
    # repeated with period S along the flattened (S*S) lane axis, then cast to
    # attn dtype so the big multiply runs in the input precision.
    x0f = x0.reshape(S, 1).astype(jnp.float32)
    s = (1.0 + x0f) / (1.0 - x0f + eps)
    scale = 2.0 / (1.0 + s * s)                                  # (S, 1) f32
    rep_scale = jnp.broadcast_to(scale, (S, S)).reshape(1, n_cols)
    rep_scale = rep_scale.astype(attn.dtype)

    itemsize = attn.dtype.itemsize
    sub_mult = _sublane_multiple(attn.dtype)
    # Keep 4x block (double-buffered in + out) well under v7x's 64 MiB VMEM.
    target_bytes = min(int(target_block_bytes), 10 << 20)
    tb, lc = _choose_tiles(n_rows, n_cols, itemsize, sub_mult, target_bytes)
    grid = (pl.cdiv(n_rows, tb), pl.cdiv(n_cols, lc))

    block_bytes = tb * lc * itemsize
    scale_block_bytes = lc * rep_scale.dtype.itemsize
    vmem_est = 2 * (2 * block_bytes + scale_block_bytes)   # double-buffered
    vmem_limit = int(min(max(vmem_est + (8 << 20), 32 << 20), 48 << 20))

    n_elems = n_rows * n_cols
    cost = pl.CostEstimate(
        flops=n_elems,                       # one multiply per element
        transcendentals=0,
        bytes_accessed=2 * n_elems * itemsize
        + grid[0] * n_cols * rep_scale.dtype.itemsize,
    )

    out2d = pl.pallas_call(
        _stereo_scaling_kernel,
        out_shape=jax.ShapeDtypeStruct((n_rows, n_cols), attn.dtype),
        grid_spec=pltpu.PrefetchScalarGridSpec(
            num_scalar_prefetch=0,
            grid=grid,
            in_specs=[
                pl.BlockSpec((1, lc), lambda i, j: (0, j)),    # repeated scale
                pl.BlockSpec((tb, lc), lambda i, j: (i, j)),   # attn tile
            ],
            out_specs=pl.BlockSpec((tb, lc), lambda i, j: (i, j)),
        ),
        compiler_params=pltpu.CompilerParams(
            dimension_semantics=("parallel", "parallel"),
            vmem_limit_bytes=vmem_limit,
        ),
        cost_estimate=cost,
    )(rep_scale, attn2d)

    return out2d.reshape(B, H, S, S)


def stereo_scaling_ref(attn, x0, eps=1e-05):
    s = (1.0 + x0) / (1.0 - x0 + eps)
    return 2.0 * attn / (1.0 + s ** 2)


def _run_case(key, B, H, S, dtype=jnp.float32, tol=1e-5):
    k_attn, k_x0 = jax.random.split(key)
    attn = jax.random.normal(k_attn, (B, H, S, S), dtype=jnp.float32).astype(dtype)
    # Deterministic stand-in for trunc_normal_(std=0.02): clip to +/- 2*std.
    x0 = jnp.clip(
        0.02 * jax.random.normal(k_x0, (1, 1, S, 1), dtype=jnp.float32),
        -0.04, 0.04)

    out = jax.block_until_ready(stereo_scaling(attn, x0))
    ref = stereo_scaling_ref(attn.astype(jnp.float32), x0)

    assert out.shape == (B, H, S, S)
    assert out.dtype == attn.dtype
    assert jnp.allclose(out.astype(jnp.float32), ref, atol=tol, rtol=tol), \
        f"mismatch vs reference at (B,H,S,dtype)=({B},{H},{S},{dtype})"


if __name__ == "__main__":
    key = jax.random.PRNGKey(0)
    k1, k2, k3 = jax.random.split(key, 3)

    # Small shape consistent with the module (chess-board-sized sequence).
    _run_case(k1, B=2, H=4, S=8)
    # Lane-dense case (S multiple of 128) exercising column tiling.
    _run_case(k2, B=1, H=2, S=128)
    # bf16 path (native bf16 multiply on v6e/v7x; one extra bf16 rounding).
    _run_case(k3, B=2, H=2, S=64, dtype=jnp.bfloat16, tol=2e-2)

    print("KERNEL_OK")
</pallas_src>

<mosaic_0001>
module attributes {stable_mosaic.version = 11 : i64} {
  func.func @_stereo_scaling_kernel(%arg0: i32, %arg1: i32, %arg2: memref<1x64xf32, #tpu.memory_space<vmem>>, %arg3: memref<8x64xf32, #tpu.memory_space<vmem>>, %arg4: memref<8x64xf32, #tpu.memory_space<vmem>>) attributes {dimension_semantics = [#tpu.dimension_semantics<parallel>, #tpu.dimension_semantics<parallel>], iteration_bounds = array<i64: 1, 1>, scalar_prefetch = 0 : i64, scratch_operands = 0 : i64, tpu.core_type = #tpu.core_type<tc>, window_params = [{transform_indices = @transform_0, window_bounds = array<i64: 1, 64>}, {transform_indices = @transform_1, window_bounds = array<i64: 8, 64>}, {transform_indices = @transform_2, window_bounds = array<i64: 8, 64>}]} {
    %c0 = arith.constant 0 : index
    %c0_0 = arith.constant 0 : index
    %0 = vector.load %arg3[%c0, %c0_0] : memref<8x64xf32, #tpu.memory_space<vmem>>, vector<8x64xf32>
    %c0_1 = arith.constant 0 : index
    %c0_2 = arith.constant 0 : index
    %1 = vector.load %arg2[%c0_1, %c0_2] : memref<1x64xf32, #tpu.memory_space<vmem>>, vector<1x64xf32>
    %2 = vector.broadcast %1 : vector<1x64xf32> to vector<8x64xf32>
    %3 = arith.mulf %0, %2 : vector<8x64xf32>
    %c0_3 = arith.constant 0 : index
    %c0_4 = arith.constant 0 : index
    %4 = vector.load %arg4[%c0_3, %c0_4] : memref<8x64xf32, #tpu.memory_space<vmem>>, vector<8x64xf32>
    tpu.vector_store %arg4[%c0_3, %c0_4], %3 {strides = array<i32>} : memref<8x64xf32, #tpu.memory_space<vmem>>, vector<8x64xf32>,
    return
  }
  func.func @transform_0(%arg0: i32, %arg1: i32) -> (i32, i32) {
    %c0_i32 = arith.constant 0 : i32
    %c0_i32_0 = arith.constant 0 : i32
    return %c0_i32, %arg1 : i32, i32
  }
  func.func @transform_1(%arg0: i32, %arg1: i32) -> (i32, i32) {
    %c0_i32 = arith.constant 0 : i32
    return %arg0, %arg1 : i32, i32
  }
  func.func @transform_2(%arg0: i32, %arg1: i32) -> (i32, i32) {
    %c0_i32 = arith.constant 0 : i32
    return %arg0, %arg1 : i32, i32
  }
}

</mosaic_0001>

<bundles_post_ra>
// kernel: tpu_custom_call.1
= control target key start
LH: loop header
LB: loop body
LE: loop exit
PB: predicated region body
PF: predicated region fallthrough
CT: control target
= control target key end

     0   :  { %7 = vsyncpa [#allocation3], 0  ;;  %s160_s0 = inlined_call_operand.hbm [shape: f32[1,64], index: 0, kind: input, shape index: {}]   ;;  %s161_s1 = inlined_call_operand.hbm [shape: f32[8,64], index: 1, kind: input, shape index: {}]   ;;  %s162_s2 = inlined_call_operand.hbm [shape: f32[8,64], index: 2, kind: output, shape index: {}]  }
   0x1   :  { %8 = vsyncpa [#allocation6], 0 }
   0x2   :  { %9 = vsyncpa [#allocation4], 0  ;;  %s133_s9 = smov [#allocation2]   ;;  %s134_s11 = smov [#allocation5]  }
   0x3   :  { %s16_s10 = sshll.u32 %s133_s9, 4  ;;  %s26_s12 = sshll.u32 %s134_s11, 4  ;;  %s17_s10 = int_to_ptr.vmem [resolvable:$true] %s16_s10  ;;  %s27_s12 = int_to_ptr.vmem [resolvable:$true] %s26_s12 }
   0x4   :  { %s75_s13 = scalar_lea.vmem %s17_s10, 16  ;;  %s79_s14 = scalar_lea.vmem %s17_s10, 32 }
   0x5   :  { %p76_p0 = scmp.ne.s32.totalorder %s17_s10, %s75_s13  ;;  %p80_p1 = scmp.lt.s32.totalorder %s17_s10, %s17_s10 }
   0x6   :  { %p81_p2 = scmp.lt.s32.totalorder %s79_s14, %s75_s13 }
   0x8   :  { %p82_p3 = por %p81_p2, %p80_p1 }
   0xa   :  { %p83_p4 = pnand %p82_p3, %p76_p0 }
   0xc   :  { %86 = shalt.err (!%p83_p4)
}
   0xd   :  { %19 = dma.hbm_to_vmem [thread:$0]  %s160_s0, 16, %s17_s10, [#allocation3]  }
   0xe   :  { %s95_s17 = scalar_lea.vmem %s27_s12, 128  ;;  %p100_p6 = scmp.lt.s32.totalorder %s27_s12, %s27_s12 }
   0xf   :  { %p96_p5 = scmp.ne.s32.totalorder %s27_s12, %s95_s17  ;;  %p101_p7 = scmp.lt.s32.totalorder %s95_s17, %s95_s17 }
  0x11   :  { %p102_p8 = por %p101_p7, %p100_p6 }
  0x13   :  { %p103_p9 = pnand %p102_p8, %p96_p5 }
  0x15   :  { %106 = shalt.err (!%p103_p9)
}
  0x16   :  { %29 = dma.hbm_to_vmem [thread:$0]  %s161_s1, 128, %s27_s12, [#allocation6]  }
  0x17   :  { %127 = dma.done.wait [#allocation3], 16  }
  0x18   :  { %128 = vsyncadd [#allocation3], 4294967280 }
  0x19   :  { %129 = dma.done.wait [#allocation6], 128  }
  0x1a   :  { %130 = vsyncadd [#allocation6], 4294967168  ;;  %s135_s20 = smov [#allocation7]   ;;  %v36_v0 = vld [vmem:[#allocation5] sm:$0xff]  ;;  %v63_v1 = vld [vmem:[#allocation2] ss:$0 sm:$0xff] }
  0x1b   :  { %s53_s21 = sshll.u32 %s135_s20, 4  ;;  %vm45_vm0 = vcmask 523264   ;;  %v44_v2 = vmul.f32 %v63_v1, %v36_v0  ;;  %s54_s21 = int_to_ptr.vmem [resolvable:$true] %s53_s21 }
  0x1c   :  { %s107_s0 = scalar_lea.vmem %s54_s21, 128  ;;  %p112_p11 = scmp.lt.s32.totalorder %s54_s21, %s54_s21 }
  0x1d   :  { %46 = vst.msk [vmem:[#allocation7] sm:$0xff] %vm45_vm0, %v44_v2  ;;  %p108_p10 = scmp.ne.s32.totalorder %s54_s21, %s107_s0  ;;  %p113_p12 = scmp.lt.s32.totalorder %s107_s0, %s107_s0 }
  0x1f   :  { %p114_p13 = por %p113_p12, %p112_p11 }
  0x21   :  { %p115_p0 = pnand %p114_p13, %p108_p10 }
  0x23   :  { %118 = shalt.err (!%p115_p0)
}
  0x24   :  { %56 = dma.vmem_to_hbm [thread:$0]  %s54_s21, 128, %s162_s2, [#allocation4]  }
  0x25   :  { %131 = dma.done.wait [#allocation4], 128  }
  0x26   :  { %132 = vsyncadd [#allocation4], 4294967168 }
  0x27   :  { %60 = vsyncpa [#allocation3], 1 }
  0x28   :  { %61 = vsyncpa [#allocation6], 1 }
  0x29   :  { %62 = vsyncpa [#allocation4], 1 }

</bundles_post_ra>
